<compile_context>
chip_gen: v5e
topology: v5e:2x2
jax: 0.10.0
libtpu: 0.0.40
codegen_flags: <defaults>
</compile_context>

<pallas_src>
import functools

import numpy as np
import jax
import jax.numpy as jnp
from jax.experimental import pallas as pl
from jax.experimental.pallas import tpu as pltpu

# Tiles below are sized far under this; 32 MiB is valid on v5e/v6e (128 MiB
# physical) and v7x (64 MiB physical).
_VMEM_LIMIT = 32 * 1024 * 1024


def _round_up(x, m):
    return -(-x // m) * m


def get_vgg2l_odim(idim, in_channel=1, out_channel=128):
    idim = idim / in_channel
    idim = np.ceil(np.array(idim, dtype=np.float32) / 2)
    idim = np.ceil(np.array(idim, dtype=np.float32) / 2)
    return int(idim) * out_channel


# ---------------------------------------------------------------------------
# Conv 3x3 (stride 1, pad 1) + bias + ReLU  —  time-tiled im2col matmul
# ---------------------------------------------------------------------------
def _conv3x3_relu_kernel(x_ref, w_ref, b_ref, o_ref, *, tt, f):
    # x_ref: (tt+2, f+2, Cin) bf16 zero-padded tile (2-row/2-col halo)
    # w_ref: (9*Cin, Cout) bf16 im2col weight (tap-major, tap = kh*3 + kw)
    # b_ref: (1, Cout) f32;  o_ref: (tt*f, Cout) bf16
    x = x_ref[...]
    cols = []
    for dh in range(3):
        for dw in range(3):
            patch = x[dh:dh + tt, dw:dw + f, :]          # (tt, f, Cin)
            cols.append(patch.reshape(tt * f, patch.shape[-1]))
    patches = jnp.concatenate(cols, axis=1)              # (tt*f, 9*Cin) im2col
    acc = jnp.dot(patches, w_ref[...], preferred_element_type=jnp.float32)
    acc = acc + b_ref[...]
    o_ref[...] = jnp.maximum(acc, 0.0).astype(o_ref.dtype)


def conv3x3_relu(x, w9, b, t_tile=64):
    # x: (B, T, F, Cin) NHWC (channels on lanes); w9: (9, Cin, Cout); b: (1, Cout)
    B, T, F, Cin = x.shape
    Cout = w9.shape[-1]
    tt = min(t_tile, T)
    nT = -(-T // tt)
    Tp = nT * tt
    # zero conv halo (+1 each side in time/freq) and pad time up to a tile multiple
    xp = jnp.pad(x, ((0, 0), (1, 1 + Tp - T), (1, 1), (0, 0)))
    # overlapping time tiles with the 2-row halo duplicated: (B, nT, tt+2, F+2, Cin)
    tiles = jnp.stack([xp[:, i * tt:i * tt + tt + 2] for i in range(nT)], axis=1)

    kernel = functools.partial(_conv3x3_relu_kernel, tt=tt, f=F)
    out = pl.pallas_call(
        kernel,
        out_shape=jax.ShapeDtypeStruct((B, nT, tt * F, Cout), jnp.bfloat16),
        grid=(B, nT),
        in_specs=[
            pl.BlockSpec((None, None, tt + 2, F + 2, Cin),
                         lambda bi, ti: (bi, ti, 0, 0, 0)),
            pl.BlockSpec((9 * Cin, Cout), lambda bi, ti: (0, 0)),
            pl.BlockSpec((1, Cout), lambda bi, ti: (0, 0)),
        ],
        out_specs=pl.BlockSpec((None, None, tt * F, Cout),
                               lambda bi, ti: (bi, ti, 0, 0)),
        compiler_params=pltpu.CompilerParams(
            dimension_semantics=("parallel", "parallel"),
            vmem_limit_bytes=_VMEM_LIMIT),
    )(tiles.astype(jnp.bfloat16),
      w9.reshape(9 * Cin, Cout).astype(jnp.bfloat16),
      b.astype(jnp.float32))

    out = out.reshape(B, Tp, F, Cout)        # free row-major reshape
    return out[:, :T] if Tp > T else out


# ---------------------------------------------------------------------------
# MaxPool 2x2 stride 2, ceil_mode=True (in-kernel, transpose-free)
# ---------------------------------------------------------------------------
def _maxpool_kernel(x_ref, o_ref):
    # x_ref: (To, 2, Fo, 2*C);  o_ref: (To, Fo, C)
    C = o_ref.shape[-1]
    x = jnp.max(x_ref[...], axis=1)                        # pool over time pair
    o_ref[...] = jnp.maximum(x[:, :, :C], x[:, :, C:])     # pool over freq pair


def maxpool2x2_ceil(x):
    # x: (B, T, F, C).  Values are post-ReLU (>= 0) so zero-padding the odd
    # edge is equivalent to ceil_mode's implicit -inf padding.
    B, T, F, C = x.shape
    To, Fo = -(-T // 2), -(-F // 2)
    if (2 * To - T) or (2 * Fo - F):
        x = jnp.pad(x, ((0, 0), (0, 2 * To - T), (0, 2 * Fo - F), (0, 0)))
    xr = x.reshape(B, To, 2, Fo, 2 * C)   # free row-major regroup, NO transpose
    return pl.pallas_call(
        _maxpool_kernel,
        out_shape=jax.ShapeDtypeStruct((B, To, Fo, C), x.dtype),
        grid=(B,),
        in_specs=[pl.BlockSpec((None, To, 2, Fo, 2 * C),
                               lambda bi: (bi, 0, 0, 0, 0))],
        out_specs=pl.BlockSpec((None, To, Fo, C), lambda bi: (bi, 0, 0, 0)),
        compiler_params=pltpu.CompilerParams(
            dimension_semantics=("parallel",), vmem_limit_bytes=_VMEM_LIMIT),
    )(xr)


# ---------------------------------------------------------------------------
# LSTM layer = hoisted gate projection (big matmul)  +  thin recurrence kernel
# ---------------------------------------------------------------------------
def _gate_proj_kernel(x_ref, w_ref, b_ref, o_ref):
    # x_ref: (mt, D) bf16; w_ref: (4, D, H) bf16; b_ref: (4, 1, H) f32
    # o_ref: (4, mt, H) f32 — gate-major (i, f, g, o), no lane slicing needed later
    x = x_ref[...]
    for k in range(4):
        o_ref[k] = (jnp.dot(x, w_ref[k], preferred_element_type=jnp.float32)
                    + b_ref[k])


def lstm_gate_proj(x_tbd, wih, b, m_tile=512):
    # x_tbd: (T, B, D) time-major; wih: (4, D, H); b: (4, 1, H) (= b_ih + b_hh)
    T, B, D = x_tbd.shape
    H = wih.shape[-1]
    M = T * B
    mt = min(m_tile, _round_up(M, 8))
    Mp = _round_up(M, mt)
    x2d = x_tbd.reshape(M, D).astype(jnp.bfloat16)
    if Mp > M:
        x2d = jnp.pad(x2d, ((0, Mp - M), (0, 0)))
    gx = pl.pallas_call(
        _gate_proj_kernel,
        out_shape=jax.ShapeDtypeStruct((4, Mp, H), jnp.float32),
        grid=(Mp // mt,),
        in_specs=[
            pl.BlockSpec((mt, D), lambda i: (i, 0)),
            pl.BlockSpec((4, D, H), lambda i: (0, 0, 0)),
            pl.BlockSpec((4, 1, H), lambda i: (0, 0, 0)),
        ],
        out_specs=pl.BlockSpec((4, mt, H), lambda i: (0, i, 0)),
        compiler_params=pltpu.CompilerParams(
            dimension_semantics=("parallel",), vmem_limit_bytes=_VMEM_LIMIT),
    )(x2d, wih.astype(jnp.bfloat16), b.astype(jnp.float32))
    return gx[:, :M].reshape(4, T, B, H)


def _lstm_recurrence_kernel(gx_ref, whh_ref, o_ref, h_sc, c_sc):
    # gx_ref: (4, B, H) f32 precomputed x@Wih + b for this timestep
    # whh_ref: (4, H, H) bf16 per-gate recurrent weights; o_ref: (B, H) bf16
    t = pl.program_id(0)

    @pl.when(t == 0)
    def _():
        h_sc[...] = jnp.zeros_like(h_sc)
        c_sc[...] = jnp.zeros_like(c_sc)

    hb = h_sc[...].astype(whh_ref.dtype)

    def gate(k):
        return gx_ref[k] + jnp.dot(hb, whh_ref[k],
                                   preferred_element_type=jnp.float32)

    i = jax.nn.sigmoid(gate(0))
    f = jax.nn.sigmoid(gate(1))
    g = jnp.tanh(gate(2))
    o = jax.nn.sigmoid(gate(3))
    c = f * c_sc[...] + i * g
    h = o * jnp.tanh(c)
    c_sc[...] = c
    h_sc[...] = h
    o_ref[...] = h.astype(o_ref.dtype)


def lstm_recurrence(gx, whh):
    # gx: (4, T, B, H) f32; whh: (4, H, H)
    _, T, B, H = gx.shape
    return pl.pallas_call(
        _lstm_recurrence_kernel,
        out_shape=jax.ShapeDtypeStruct((T, B, H), jnp.bfloat16),
        grid=(T,),
        in_specs=[
            pl.BlockSpec((4, None, B, H), lambda t: (0, t, 0, 0)),
            pl.BlockSpec((4, H, H), lambda t: (0, 0, 0)),
        ],
        out_specs=pl.BlockSpec((None, B, H), lambda t: (t, 0, 0)),
        scratch_shapes=[pltpu.VMEM((B, H), jnp.float32),
                        pltpu.VMEM((B, H), jnp.float32)],
        compiler_params=pltpu.CompilerParams(
            dimension_semantics=("arbitrary",), vmem_limit_bytes=_VMEM_LIMIT),
    )(gx, whh.astype(jnp.bfloat16))


# ---------------------------------------------------------------------------
# Final Linear projection (classes padded to 128 lanes inside the kernel)
# ---------------------------------------------------------------------------
def _linear_kernel(x_ref, w_ref, b_ref, o_ref):
    o_ref[...] = (jnp.dot(x_ref[...], w_ref[...],
                          preferred_element_type=jnp.float32) + b_ref[...])


def linear(x2d, w, b, m_tile=512):
    # x2d: (M, H); w: (H, NC); b: (1, NC)
    M, H = x2d.shape
    NC = w.shape[-1]
    NCp = _round_up(NC, 128)          # lane-dense, unmasked stores
    mt = min(m_tile, _round_up(M, 8))
    Mp = _round_up(M, mt)
    xb = x2d.astype(jnp.bfloat16)
    if Mp > M:
        xb = jnp.pad(xb, ((0, Mp - M), (0, 0)))
    wp = jnp.pad(w, ((0, 0), (0, NCp - NC))).astype(jnp.bfloat16)
    bp = jnp.pad(b, ((0, 0), (0, NCp - NC))).astype(jnp.float32)
    out = pl.pallas_call(
        _linear_kernel,
        out_shape=jax.ShapeDtypeStruct((Mp, NCp), jnp.float32),
        grid=(Mp // mt,),
        in_specs=[
            pl.BlockSpec((mt, H), lambda i: (i, 0)),
            pl.BlockSpec((H, NCp), lambda i: (0, 0)),
            pl.BlockSpec((1, NCp), lambda i: (0, 0)),
        ],
        out_specs=pl.BlockSpec((mt, NCp), lambda i: (i, 0)),
        compiler_params=pltpu.CompilerParams(
            dimension_semantics=("parallel",), vmem_limit_bytes=_VMEM_LIMIT),
    )(xb, wp, bp)
    return out[:M, :NC]


# ---------------------------------------------------------------------------
# Full VGGLSTM forward
# ---------------------------------------------------------------------------
def vgg_lstm_forward(params, x, ilens, in_channel):
    # x: (B, T, idim) batch-first, idim = in_channel * freq (channel-major split)
    B, T, idim = x.shape
    F = idim // in_channel
    # PyTorch: view(B,T,C,F).transpose(1,2) -> NCHW; here NHWC (B,T,F,C) with
    # channels on the lane dim.  bf16 activations feed all MXU matmuls.
    h = x.reshape(B, T, in_channel, F).transpose(0, 1, 3, 2).astype(jnp.bfloat16)

    h = conv3x3_relu(h, params["c11_w"], params["c11_b"])
    h = conv3x3_relu(h, params["c12_w"], params["c12_b"])
    h = maxpool2x2_ceil(h)
    h = conv3x3_relu(h, params["c21_w"], params["c21_b"])
    h = conv3x3_relu(h, params["c22_w"], params["c22_b"])
    h = maxpool2x2_ceil(h)

    # (B, T2, F2, C=128) -> PyTorch feature order is channel-major: (B, T2, C*F2)
    B_, T2, F2, Cc = h.shape
    vgg_o = h.transpose(0, 1, 3, 2).reshape(B, T2, Cc * F2)

    olens = jnp.ceil(jnp.ceil(ilens.astype(jnp.float32) / 2.0) / 2.0).astype(jnp.int32)

    # LSTM stack (time-major).  Per layer: hoisted x@Wih projection (one big
    # tiled matmul over all timesteps) + thin h@Whh recurrence kernel.
    xt = vgg_o.transpose(1, 0, 2)                      # (T2, B, D)
    for layer in params["lstm"]:
        gx = lstm_gate_proj(xt, layer["wih"], layer["b"])
        xt = lstm_recurrence(gx, layer["whh"])
    # TODO(synk): nn.LSTM inter-layer dropout is train-only; omitted (inference).

    # pack/pad_packed_sequence: zero-fill LSTM outputs beyond each olen, then
    # apply the Linear (padded frames get the bias, as in PyTorch).
    T2_, B2, H = xt.shape
    mask = (jnp.arange(T2_)[:, None] < olens[None, :])[:, :, None]
    xt = jnp.where(mask, xt, jnp.zeros((), xt.dtype))

    out2d = linear(xt.reshape(T2_ * B2, H), params["lin_w"], params["lin_b"])
    nc = params["lin_w"].shape[-1]
    out = out2d.reshape(T2_, B2, nc).transpose(1, 0, 2)   # (B, T2, num_classes)
    return out, olens


# ---------------------------------------------------------------------------
# Deterministic parameter initialization (shapes from the module's __init__)
# ---------------------------------------------------------------------------
def init_params(key, idim, hdim, n_layers, num_classes, in_channel):
    keys = jax.random.split(key, 64)
    it = iter(keys)

    def nrm(shape, scale=0.1):
        return scale * jax.random.normal(next(it), shape, dtype=jnp.float32)

    params = {}
    for name, cin, cout in [("c11", in_channel, 64), ("c12", 64, 64),
                            ("c21", 64, 128), ("c22", 128, 128)]:
        params[name + "_w"] = nrm((9, cin, cout))   # tap = kh*3+kw, (tap, Cin, Cout)
        params[name + "_b"] = nrm((1, cout))

    d_in = get_vgg2l_odim(idim, in_channel=in_channel, out_channel=128)
    layers = []
    din = d_in
    for _ in range(n_layers):
        layers.append({
            # gate-major layouts, gate order (i, f, g, o) as in PyTorch nn.LSTM
            "wih": nrm((4, din, hdim)),    # per-gate slice of weight_ih^T
            "whh": nrm((4, hdim, hdim)),   # per-gate slice of weight_hh^T
            "b": nrm((4, 1, hdim)),        # b_ih + b_hh combined, per gate
        })
        din = hdim
    params["lstm"] = layers
    params["lin_w"] = nrm((hdim, num_classes))     # transposed PyTorch Linear weight
    params["lin_b"] = nrm((1, num_classes))
    return params


if __name__ == "__main__":
    B, T, in_channel, freq = 2, 8, 3, 16
    idim = in_channel * freq          # 48
    hdim, n_layers, num_classes = 32, 2, 10

    key = jax.random.PRNGKey(0)
    kx, kp = jax.random.split(key)
    x = jax.random.normal(kx, (B, T, idim), dtype=jnp.float32)
    ilens = jnp.array([8, 5], dtype=jnp.int32)

    params = init_params(kp, idim, hdim, n_layers, num_classes, in_channel)

    out, olens = vgg_lstm_forward(params, x, ilens, in_channel)
    jax.block_until_ready(out)
    jax.block_until_ready(olens)

    expected_T = int(np.ceil(np.ceil(T / 2) / 2))
    assert out.shape == (B, expected_T, num_classes), out.shape
    assert olens.shape == (B,), olens.shape
    assert bool(jnp.all(jnp.isfinite(out)))
    print("KERNEL_OK")
</pallas_src>

<mosaic_0001>
module attributes {stable_mosaic.version = 11 : i64} {
  func.func @_conv3x3_relu_kernel(%arg0: i32, %arg1: i32, %arg2: memref<1x1x10x18x3xbf16, #tpu.memory_space<vmem>>, %arg3: memref<27x64xbf16, #tpu.memory_space<vmem>>, %arg4: memref<1x64xf32, #tpu.memory_space<vmem>>, %arg5: memref<1x1x128x64xbf16, #tpu.memory_space<vmem>>) attributes {dimension_semantics = [#tpu.dimension_semantics<parallel>, #tpu.dimension_semantics<parallel>], iteration_bounds = array<i64: 2, 1>, scalar_prefetch = 0 : i64, scratch_operands = 0 : i64, tpu.core_type = #tpu.core_type<tc>, window_params = [{transform_indices = @transform_0, window_bounds = array<i64: 1, 1, 10, 18, 3>}, {pipeline_mode = #tpu.pipeline_mode<synchronous>, transform_indices = @transform_1, window_bounds = array<i64: 27, 64>}, {pipeline_mode = #tpu.pipeline_mode<synchronous>, transform_indices = @transform_2, window_bounds = array<i64: 1, 64>}, {transform_indices = @transform_3, window_bounds = array<i64: 1, 1, 128, 64>}]} {
    %c0 = arith.constant 0 : index
    %c0_0 = arith.constant 0 : index
    %c0_1 = arith.constant 0 : index
    %c0_2 = arith.constant 0 : index
    %c0_3 = arith.constant 0 : index
    %0 = vector.load %arg2[%c0, %c0_0, %c0_1, %c0_2, %c0_3] : memref<1x1x10x18x3xbf16, #tpu.memory_space<vmem>>, vector<1x1x10x18x3xbf16>
    %1 = vector.shape_cast %0 : vector<1x1x10x18x3xbf16> to vector<10x18x3xbf16>
    %2 = vector.extract_strided_slice %1 {offsets = [0, 0, 0], sizes = [8, 16, 3], strides = [1, 1, 1]} : vector<10x18x3xbf16> to vector<8x16x3xbf16>
    %3 = vector.shape_cast %2 : vector<8x16x3xbf16> to vector<128x3xbf16>
    %4 = vector.extract_strided_slice %1 {offsets = [0, 1, 0], sizes = [8, 16, 3], strides = [1, 1, 1]} : vector<10x18x3xbf16> to vector<8x16x3xbf16>
    %5 = vector.shape_cast %4 : vector<8x16x3xbf16> to vector<128x3xbf16>
    %6 = vector.extract_strided_slice %1 {offsets = [0, 2, 0], sizes = [8, 16, 3], strides = [1, 1, 1]} : vector<10x18x3xbf16> to vector<8x16x3xbf16>
    %7 = vector.shape_cast %6 : vector<8x16x3xbf16> to vector<128x3xbf16>
    %8 = vector.extract_strided_slice %1 {offsets = [1, 0, 0], sizes = [8, 16, 3], strides = [1, 1, 1]} : vector<10x18x3xbf16> to vector<8x16x3xbf16>
    %9 = vector.shape_cast %8 : vector<8x16x3xbf16> to vector<128x3xbf16>
    %10 = vector.extract_strided_slice %1 {offsets = [1, 1, 0], sizes = [8, 16, 3], strides = [1, 1, 1]} : vector<10x18x3xbf16> to vector<8x16x3xbf16>
    %11 = vector.shape_cast %10 : vector<8x16x3xbf16> to vector<128x3xbf16>
    %12 = vector.extract_strided_slice %1 {offsets = [1, 2, 0], sizes = [8, 16, 3], strides = [1, 1, 1]} : vector<10x18x3xbf16> to vector<8x16x3xbf16>
    %13 = vector.shape_cast %12 : vector<8x16x3xbf16> to vector<128x3xbf16>
    %14 = vector.extract_strided_slice %1 {offsets = [2, 0, 0], sizes = [8, 16, 3], strides = [1, 1, 1]} : vector<10x18x3xbf16> to vector<8x16x3xbf16>
    %15 = vector.shape_cast %14 : vector<8x16x3xbf16> to vector<128x3xbf16>
    %16 = vector.extract_strided_slice %1 {offsets = [2, 1, 0], sizes = [8, 16, 3], strides = [1, 1, 1]} : vector<10x18x3xbf16> to vector<8x16x3xbf16>
    %17 = vector.shape_cast %16 : vector<8x16x3xbf16> to vector<128x3xbf16>
    %18 = vector.extract_strided_slice %1 {offsets = [2, 2, 0], sizes = [8, 16, 3], strides = [1, 1, 1]} : vector<10x18x3xbf16> to vector<8x16x3xbf16>
    %19 = vector.shape_cast %18 : vector<8x16x3xbf16> to vector<128x3xbf16>
    %20 = tpu.concatenate %3, %5, %7, %9, %11, %13, %15, %17, %19 in 1 : vector<128x3xbf16>, vector<128x3xbf16>, vector<128x3xbf16>, vector<128x3xbf16>, vector<128x3xbf16>, vector<128x3xbf16>, vector<128x3xbf16>, vector<128x3xbf16>, vector<128x3xbf16> -> vector<128x27xbf16>
    %c0_4 = arith.constant 0 : index
    %c0_5 = arith.constant 0 : index
    %21 = vector.load %arg3[%c0_4, %c0_5] : memref<27x64xbf16, #tpu.memory_space<vmem>>, vector<27x64xbf16>
    %cst = arith.constant dense<0.000000e+00> : vector<128x64xf32>
    %22 = tpu.matmul %20, %21, %cst {dimension_numbers = #tpu.dot_dimension_numbers<[1], [0], [0], [1], [0, 0, 1, 1], [], []>} : vector<128x27xbf16>, vector<27x64xbf16>, vector<128x64xf32> -> vector<128x64xf32>
    %c0_6 = arith.constant 0 : index
    %c0_7 = arith.constant 0 : index
    %23 = vector.load %arg4[%c0_6, %c0_7] : memref<1x64xf32, #tpu.memory_space<vmem>>, vector<1x64xf32>
    %24 = vector.broadcast %23 : vector<1x64xf32> to vector<128x64xf32>
    %25 = arith.addf %22, %24 : vector<128x64xf32>
    %cst_8 = arith.constant 0.000000e+00 : f32
    %26 = vector.broadcast %cst_8 : f32 to vector<128x64xf32>
    %27 = arith.maximumf %25, %26 : vector<128x64xf32>
    %28 = arith.truncf %27 : vector<128x64xf32> to vector<128x64xbf16>
    %c0_9 = arith.constant 0 : index
    %c0_10 = arith.constant 0 : index
    %c0_11 = arith.constant 0 : index
    %c0_12 = arith.constant 0 : index
    %29 = vector.load %arg5[%c0_9, %c0_10, %c0_11, %c0_12] : memref<1x1x128x64xbf16, #tpu.memory_space<vmem>>, vector<1x1x128x64xbf16>
    %30 = vector.shape_cast %29 : vector<1x1x128x64xbf16> to vector<128x64xbf16>
    %31 = vector.shape_cast %28 : vector<128x64xbf16> to vector<1x1x128x64xbf16>
    tpu.vector_store %arg5[%c0_9, %c0_10, %c0_11, %c0_12], %31 {strides = array<i32>} : memref<1x1x128x64xbf16, #tpu.memory_space<vmem>>, vector<1x1x128x64xbf16>,
    return
  }
  func.func @transform_0(%arg0: i32, %arg1: i32) -> (i32, i32, i32, i32, i32) {
    %c0_i32 = arith.constant 0 : i32
    %c0_i32_0 = arith.constant 0 : i32
    %c0_i32_1 = arith.constant 0 : i32
    %c0_i32_2 = arith.constant 0 : i32
    return %arg0, %arg1, %c0_i32, %c0_i32_0, %c0_i32_1 : i32, i32, i32, i32, i32
  }
  func.func @transform_1(%arg0: i32, %arg1: i32) -> (i32, i32) {
    %c0_i32 = arith.constant 0 : i32
    %c0_i32_0 = arith.constant 0 : i32
    %c0_i32_1 = arith.constant 0 : i32
    return %c0_i32, %c0_i32_0 : i32, i32
  }
  func.func @transform_2(%arg0: i32, %arg1: i32) -> (i32, i32) {
    %c0_i32 = arith.constant 0 : i32
    %c0_i32_0 = arith.constant 0 : i32
    %c0_i32_1 = arith.constant 0 : i32
    return %c0_i32, %c0_i32_0 : i32, i32
  }
  func.func @transform_3(%arg0: i32, %arg1: i32) -> (i32, i32, i32, i32) {
    %c0_i32 = arith.constant 0 : i32
    %c0_i32_0 = arith.constant 0 : i32
    %c0_i32_1 = arith.constant 0 : i32
    return %arg0, %arg1, %c0_i32, %c0_i32_0 : i32, i32, i32, i32
  }
}

</mosaic_0001>

<bundles_post_ra>
// kernel: tpu_custom_call.1
= control target key start
LH: loop header
LB: loop body
LE: loop exit
PB: predicated region body
PF: predicated region fallthrough
CT: control target
= control target key end

     0   :  { %s1362_s12 = smov 0   ;;  %s1364_s13 = smov 0   ;;  %s1921_s0 = inlined_call_operand.vmem [shape: bf16[2,1,10,18,3], index: 0, kind: input, shape index: {}]   ;;  %s1922_s1 = inlined_call_operand.vmem [shape: bf16[27,64], index: 1, kind: input, shape index: {}]   ;;  %s1923_s2 = inlined_call_operand.vmem [shape: f32[1,64], index: 2, kind: input, shape index: {}]   ;;  %s1924_s3 = inlined_call_operand.vmem [shape: bf16[2,1,128,64], index: 3, kind: output, shape index: {}]  }
   0x1   :  { %s1366_s14 = smov 0  }
   0x2 LB: > { %s25_s15 = sadd.s32 1, %s1327_s13  ;;  %p1183_p0 = scmp.ge.s32.totalorder %s1331_s14, 1  ;;  %s1331_s14 = sphi %s1366_s14, %s13_s14   ;;  %s1327_s13 = sphi %s1364_s13, %s1930_s13   ;;  %s1323_s12 = sphi %s1362_s12, %s1929_s12  }
   0x3   : > { %p27_p1 = scmp.ge.s32.totalorder %s25_s15, 2  ;;  %p157_p2 = scmp.lt.s32.totalorder %s1331_s14, 3 }
   0x5   : > { %s1932_s15 = smov (%p27_p1, %s25_s15), 0  ;;  %p158_p3 = pnand %p1183_p0, %p157_p2 }
   0x6   : > { %p189_p4 = scmp.lt.s32.totalorder (!%p158_p3), %s1323_s12, 1  ;;  %s1333_s20 = smov (!%p158_p3), 9  }
   0x7   : > { %161 = sbr.rel (%p158_p3) target bundleno = 456 (0x1c8), region = 32  ;;  %s1334_s21 = smov (!%p158_p3), 6  }
   0x8   : > { %s1335_s22 = smov (!%p158_p3), 3   ;;  %s1336_s23 = smov (!%p158_p3), 12  }
   0x9   : > { %s1337_s24 = smov (!%p158_p3), 18   ;;  %s1338_s25 = smov (!%p158_p3), 15  }
   0xa   : > { %s1339_s26 = smov (!%p158_p3), 21   ;;  %s1340_s27 = smov (!%p158_p3), 24  }
   0xc   : > { %s1934_s12 = smov (!%p189_p4, %s1323_s12), 1  ;;  %vm457_vm0 = vcmask 1042432   ;;  %vm458_vm1 = vcmask 1046532   ;;  %vm238_vm3 = vsmask.f32 3328  ;;  %vm982_vm6 = vcmask 1044480  }
   0xd   : > { %s1274_s16 = smul.u32 120, %s1934_s12  ;;  %vm1388_vm2 = vmor %vm457_vm0, %vm458_vm1  ;;  %vm239_vm4 = vsmask.f32 7440  ;;  %vm983_vm7 = vcmask 1045504   ;;  %vm802_vm8 = vcmask 23552   ;;  %vm827_vm9 = vcmask 48128  }
   0xe   : > { %vm1409_vm5 = vmor %vm238_vm3, %vm239_vm4  ;;  %vm844_vm10 = vcmask 72704   ;;  %vm861_vm11 = vcmask 97280   ;;  %vm878_vm12 = vcmask 121856   ;;  %vm895_vm13 = vcmask 146432   ;;  %s1255_s9 = sshll.u32 %s1934_s12, 6 }
   0xf   : > { %s1386_s19 = scalar_lea.vmem %s1921_s0, %s1274_s16  ;;  %vm929_vm14 = vcmask 195584   ;;  %vm912_vm15 = vcmask 171008   ;;  %vm965_vm0 = vcmask 220160   ;;  %s1863_s16 = scalar_lea.vmem %s1924_s3, %s1255_s9  ;;  %vm1070_vm1 = vcmask 519168  }
  0x10   : > { %v220_v1 = vld [vmem:[%s1386_s19 + $0x30] sm:$0xf]  ;;  %v221_v2 = vld [vmem:[%s1386_s19 + $0x34] sm:$0xf]  ;;  %v222_v3 = vld [vmem:[%s1386_s19 + $0x38] sm:$0x1] }
  0x11   : > { %v1191_v4 = vrot.slane %v220_v1, 9  ;;  %v490_v5 = vrot.slane %v221_v2, 5  ;;  %v493_v6 = vrot.slane %v222_v3, 5  ;;  %v338_v7 = vshrl.u32 %v220_v1, 16  ;;  %v226_v8 = vld [vmem:[%s1386_s19 + $0x48] sm:$0xf] }
  0x12   : > { %v341_v9 = vshll.u32 %v220_v1, 16  ;;  %v347_v10 = vshll.u32 %v221_v2, 16  ;;  %v351_v11 = vshrl.u32 %v221_v2, 16  ;;  %v357_v12 = vshll.u32 %v222_v3, 16  ;;  %v227_v13 = vld [vmem:[%s1386_s19 + $0x4c] sm:$0xf] }
  0x13   : > { %v491_v14 = vsel %vm1388_vm2, %v1191_v4, %v490_v5  ;;  %v492_v15 = vrot.slane %v490_v5, 4  ;;  %v340_v16 = vrot.slane %v338_v7, 4  ;;  %v228_v17 = vld [vmem:[%s1386_s19 + $0x50] sm:$0x1]  ;;  %v1193_v18 = vrot.slane %v226_v8, 9  ;;  %v1401_v19 = vld [vmem:[%s1386_s19 + $0x3c] sm:$0xff] }
  0x14   : > { %v656_v20 = vunpack.c.l.b16 %v491_v14  ;;  %v343_v21 = vrot.slane %v341_v9, 5  ;;  %v349_v22 = vrot.slane %v347_v10, 5  ;;  %v353_v23 = vrot.slane %v351_v11, 4  ;;  %699 = vrot.lane.b32.xlu2 %v1401_v19, %s1333_s20  ;;  %v1420_v45 = vld [vmem:[%s1386_s19 + $0x54] sm:$0xf] }
  0x15   : > { %v494_v24 = vsel %vm1388_vm2, %v492_v15, %v493_v6  ;;  %v359_v25 = vrot.slane %v357_v12, 5  ;;  %v504_v26 = vrot.slane %v227_v13, 5  ;;  %v507_v27 = vrot.slane %v228_v17, 5  ;;  %v1423_v46 = vld [vmem:[%s1386_s19 + $0x54] sm:$0xff]  ;;  %v1435_v56 = vld [vmem:[%s1386_s19 + $0x5c] sm:$0x1] }
  0x16   : > { %v657_v28 = vunpack.c.l.b16 %v494_v24  ;;  %v344_v29 = vor.u32 %v343_v21, %v340_v16  ;;  %v354_v30 = vor.u32 %v353_v23, %v349_v22  ;;  %v386_v31 = vshrl.u32 %v226_v8, 16  ;;  %v1432_v51 = vld [vmem:[%s1386_s19 + $0x58] sm:$0xf]  ;;  %v1442_v61 = vld [vmem:[%s1386_s19 + $0x3c] sm:$0xf] }
  0x17   : > { %v505_v33 = vsel %vm1388_vm2, %v1193_v18, %v504_v26  ;;  %v506_v34 = vrot.slane %v504_v26, 4  ;;  %v389_v35 = vshll.u32 %v226_v8, 16  ;;  %v395_v36 = vshll.u32 %v227_v13, 16  ;;  %v1451_v7 = vld [vmem:[%s1386_s19 + $0x40] sm:$0xf] }
  0x18   : > { %v1415_v37 = vpack.c.b16 %v657_v28, %v656_v20  ;;  %v345_v38 = vrot.slane %v344_v29, 4  ;;  %v355_v39 = vrot.slane %v354_v30, 4  ;;  %v660_v40 = vunpack.c.l.b16 %v505_v33  ;;  %v1460_v16 = vld [vmem:[%s1386_s19 + $0x44] sm:$0x1] }
  0x19   : > { %v508_v41 = vsel %vm1388_vm2, %v506_v34, %v507_v27  ;;  %v388_v42 = vrot.slane %v386_v31, 4  ;;  %v391_v43 = vrot.slane %v389_v35, 5  ;;  %v397_v44 = vrot.slane %v395_v36, 5  ;;  %v1474_v35 = vld [vmem:[%s1386_s19 + $0x18] sm:$0xf] }
  0x1a   : > { %680 = vrot.lane.b32.xlu1 %v1415_v37, %s1334_s21  ;;  %v350_v47 = vsel %vm1409_vm5, %v345_v38, %v349_v22  ;;  %v360_v48 = vsel %vm1409_vm5, %v355_v39, %v359_v25  ;;  %v661_v49 = vunpack.c.l.b16 %v508_v41  ;;  %v399_v50 = vshrl.u32 %v227_v13, 16  ;;  %v1479_v41 = vld [vmem:[%s1386_s19 + $0x1c] sm:$0xf] }
  0x1b   : > { %v616_v52 = vunpack.c.l.b16 %v350_v47  ;;  %v617_v53 = vunpack.c.l.b16 %v360_v48  ;;  %v392_v54 = vor.u32 %v391_v43, %v388_v42  ;;  %v405_v55 = vshll.u32 %v228_v17, 16 }
  0x1c   : > { %v1437_v57 = vpack.c.b16 %v661_v49, %v660_v40  ;;  %v401_v58 = vrot.slane %v399_v50, 4  ;;  %v410_v59 = vshrl.u32 %v1420_v45, 16  ;;  %v413_v60 = vshll.u32 %v1420_v45, 16  ;;  %703 = vrot.lane.b32.xlu2 %v1423_v46, %s1333_s20 }
  0x1d   : > { %v1444_v62 = vpack.c.b16 %v617_v53, %v616_v52  ;;  %v393_v63 = vrot.slane %v392_v54, 4  ;;  %v407_v1 = vrot.slane %v405_v55, 5  ;;  %v419_v2 = vshll.u32 %v1432_v51, 16 }
  0x1e   : > { %v402_v3 = vor.u32 %v401_v58, %v397_v44  ;;  %v412_v4 = vrot.slane %v410_v59, 4  ;;  %v415_v5 = vrot.slane %v413_v60, 5  ;;  %v423_v6 = vshrl.u32 %v1432_v51, 16  ;;  %v1497_v59 = vld [vmem:[%s1386_s19 + $0x20] sm:$0x1] }
  0x1f   : > { %640 = vrot.lane.b32.xlu0 %v1444_v62, %s1335_s22  ;;  %v398_v8 = vsel %vm1409_vm5, %v393_v63, %v397_v44  ;;  %v421_v9 = vrot.slane %v419_v2, 5  ;;  %v429_v10 = vshll.u32 %v1435_v56, 16  ;;  %v362_v11 = vshrl.u32 %v1442_v61, 16 }
  0x20   : > { %v403_v12 = vrot.slane %v402_v3, 4  ;;  %v620_v13 = vunpack.c.l.b16 %v398_v8  ;;  %v416_v14 = vor.u32 %v415_v5, %v412_v4  ;;  %v425_v15 = vrot.slane %v423_v6, 4 }
  0x21   : > { %v431_v17 = vrot.slane %v429_v10, 5  ;;  %v364_v18 = vrot.slane %v362_v11, 4  ;;  %v365_v20 = vshll.u32 %v1442_v61, 16  ;;  %v371_v21 = vshll.u32 %v1451_v7, 16 }
  0x22   : > { %684 = vrot.lane.b32.xlu1 %v1437_v57, %s1334_s21  ;;  %v408_v22 = vsel %vm1409_vm5, %v403_v12, %v407_v1  ;;  %v417_v23 = vrot.slane %v416_v14, 4  ;;  %v426_v24 = vor.u32 %v425_v15, %v421_v9  ;;  %v375_v25 = vshrl.u32 %v1451_v7, 16 }
  0x23   : > { %v621_v26 = vunpack.c.l.b16 %v408_v22  ;;  %v367_v27 = vrot.slane %v365_v20, 5  ;;  %v373_v28 = vrot.slane %v371_v21, 5  ;;  %v381_v29 = vshll.u32 %v1460_v16, 16  ;;  %v209_v20 = vld [vmem:[%s1386_s19 + $0x4] sm:$0xf] }
  0x24   : > { %v422_v30 = vsel %vm1409_vm5, %v417_v23, %v421_v9  ;;  %v427_v31 = vrot.slane %v426_v24, 4  ;;  %v377_v33 = vrot.slane %v375_v25, 4  ;;  %v1194_v34 = vrot.slane %v1420_v45, 9 }
  0x25   : > { %v1476_v36 = vpack.c.b16 %v621_v26, %v620_v13  ;;  %v622_v38 = vunpack.c.l.b16 %v422_v30  ;;  %v368_v39 = vor.u32 %v367_v27, %v364_v18  ;;  %v383_v40 = vrot.slane %v381_v29, 5  ;;  %v208_v13 = vld [vmem:[%s1386_s19] sm:$0xf]  ;;  %v210_v26 = vld [vmem:[%s1386_s19 + $0x8] sm:$0x1] }
  0x26   : > { %v432_v42 = vsel %vm1409_vm5, %v427_v31, %v431_v17  ;;  %v378_v43 = vor.u32 %v377_v33, %v373_v28  ;;  %v511_v44 = vrot.slane %v1432_v51, 5  ;;  %v514_v47 = vrot.slane %v1435_v56, 5 }
  0x27   : > { %644 = vrot.lane.b32.xlu0 %v1476_v36, %s1335_s22  ;;  %v623_v45 = vunpack.c.l.b16 %v432_v42  ;;  %v369_v48 = vrot.slane %v368_v39, 4  ;;  %v290_v49 = vshrl.u32 %v1474_v35, 16  ;;  %v293_v50 = vshll.u32 %v1474_v35, 16 }
  0x28   : > { %v379_v52 = vrot.slane %v378_v43, 4  ;;  %v512_v53 = vsel %vm1388_vm2, %v1194_v34, %v511_v44  ;;  %v513_v54 = vrot.slane %v511_v44, 4  ;;  %v299_v55 = vshll.u32 %v1479_v41, 16 }
  0x29   : > { %v1492_v58 = vpack.c.b16 %v623_v45, %v622_v38  ;;  %v374_v51 = vsel %vm1409_vm5, %v369_v48, %v373_v28  ;;  %v662_v56 = vunpack.c.l.b16 %v512_v53  ;;  %v292_v60 = vrot.slane %v290_v49, 4 }
  0x2a   : > { %v384_v63 = vsel %vm1409_vm5, %v379_v52, %v383_v40  ;;  %v618_v1 = vunpack.c.l.b16 %v374_v51  ;;  %v515_v2 = vsel %vm1388_vm2, %v513_v54, %v514_v47  ;;  %v295_v3 = vrot.slane %v293_v50, 5  ;;  %v1529_v47 = vld [vmem:[%s1386_s19 + $0x60] sm:$0xf]  ;;  %v233_v51 = vld [vmem:[%s1386_s19 + $0x64] sm:$0xf] }
  0x2b   : > { %722 = vrot.lane.b32.xlu1 %v1492_v58, %s1336_s23  ;;  %v619_v4 = vunpack.c.l.b16 %v384_v63  ;;  %v663_v5 = vunpack.c.l.b16 %v515_v2  ;;  %v301_v6 = vrot.slane %v299_v55, 5  ;;  %v303_v8 = vshrl.u32 %v1479_v41, 16 }
  0x2c   : > { %v296_v9 = vor.u32 %v295_v3, %v292_v60  ;;  %v309_v10 = vshll.u32 %v1497_v59, 16  ;;  %v1192_v11 = vrot.slane %v1442_v61, 9  ;;  %v497_v12 = vrot.slane %v1451_v7, 5  ;;  %v1521_v61 = vld [vmem:[%s1386_s19 + $0x48] sm:$0xff] }
  0x2d   : > { %v1510_v14 = vpack.c.b16 %v619_v4, %v618_v1  ;;  %v1512_v15 = vpack.c.b16 %v663_v5, %v662_v56  ;;  %v305_v17 = vrot.slane %v303_v8, 4  ;;  %v500_v18 = vrot.slane %v1460_v16, 5 }
  0x2e   : > { %v297_v21 = vrot.slane %v296_v9, 4  ;;  %v311_v22 = vrot.slane %v309_v10, 5  ;;  %v498_v23 = vsel %vm1388_vm2, %v1192_v11, %v497_v12  ;;  %v499_v24 = vrot.slane %v497_v12, 4 }
  0x2f   : > { %718 = vrot.lane.b32.xlu0 %v1510_v14, %s1336_s23  ;;  %v306_v7 = vor.u32 %v305_v17, %v301_v6  ;;  %v658_v25 = vunpack.c.l.b16 %v498_v23  ;;  %v242_v27 = vshrl.u32 %v208_v13, 16  ;;  %v245_v28 = vshll.u32 %v208_v13, 16 }
  0x30   : > { %v302_v16 = vsel %vm1409_vm5, %v297_v21, %v301_v6  ;;  %v501_v29 = vsel %vm1388_vm2, %v499_v24, %v500_v18  ;;  %v251_v30 = vshll.u32 %v209_v20, 16  ;;  %v255_v31 = vshrl.u32 %v209_v20, 16  ;;  %v234_v6 = vld [vmem:[%s1386_s19 + $0x68] sm:$0x1]  ;;  %v1556_v21 = vld [vmem:[%s1386_s19 + $0x60] sm:$0xff] }
  0x31   : > { %v307_v33 = vrot.slane %v306_v7, 4  ;;  %v612_v34 = vunpack.c.l.b16 %v302_v16  ;;  %v659_v38 = vunpack.c.l.b16 %v501_v29  ;;  %v244_v39 = vrot.slane %v242_v27, 4  ;;  %v1559_v24 = vld [vmem:[%s1386_s19 + $0xc] sm:$0xf] }
  0x32   : > { %v247_v40 = vrot.slane %v245_v28, 5  ;;  %v253_v42 = vrot.slane %v251_v30, 5  ;;  %v257_v43 = vrot.slane %v255_v31, 4  ;;  %v261_v44 = vshll.u32 %v210_v26, 16  ;;  %v1563_v28 = vld [vmem:[%s1386_s19 + $0x10] sm:$0xf] }
  0x33   : > { %756 = vrot.lane.b32.xlu1 %v1521_v61, %s1337_s24  ;;  %v312_v45 = vsel %vm1409_vm5, %v307_v33, %v311_v22  ;;  %v1535_v48 = vpack.c.b16 %v659_v38, %v658_v25  ;;  %v1187_v49 = vrot.slane %v208_v13, 9  ;;  %v462_v50 = vrot.slane %v209_v20, 5 }
  0x34   : > { %v613_v52 = vunpack.c.l.b16 %v312_v45  ;;  %v248_v53 = vor.u32 %v247_v40, %v244_v39  ;;  %v258_v54 = vor.u32 %v257_v43, %v253_v42  ;;  %v263_v55 = vrot.slane %v261_v44, 5  ;;  %v1573_v45 = vld [vmem:[%s1386_s19 + $0x14] sm:$0x1] }
  0x35   : > { %737 = vrot.lane.b32.xlu2 %v1535_v48, %s1338_s25  ;;  %v463_v56 = vsel %vm1388_vm2, %v1187_v49, %v462_v50  ;;  %v464_v60 = vrot.slane %v462_v50, 4  ;;  %v465_v63 = vrot.slane %v210_v26, 5  ;;  %v517_v1 = vshrl.u32 %v1529_v47, 16 }
  0x36   : > { %v1543_v2 = vpack.c.b16 %v613_v52, %v612_v34  ;;  %v249_v3 = vrot.slane %v248_v53, 4  ;;  %v259_v4 = vrot.slane %v258_v54, 4  ;;  %v520_v9 = vshll.u32 %v1529_v47, 16 }
  0x37   : > { %741 = vrot.lane.b32.xlu0 %v1512_v15, %s1338_s25  ;;  %v466_v5 = vsel %vm1388_vm2, %v464_v60, %v465_v63  ;;  %v519_v8 = vrot.slane %v517_v1, 4  ;;  %v526_v10 = vshll.u32 %v233_v51, 16  ;;  %v648_v13 = vunpack.c.l.b16 %v463_v56 }
  0x38   : > { %v254_v11 = vsel %vm1409_vm5, %v249_v3, %v253_v42  ;;  %v264_v12 = vsel %vm1409_vm5, %v259_v4, %v263_v55  ;;  %v530_v17 = vshrl.u32 %v233_v51, 16  ;;  %v522_v22 = vrot.slane %v520_v9, 5 }
  0x39   : > { %v608_v18 = vunpack.c.l.b16 %v254_v11  ;;  %v609_v20 = vunpack.c.l.b16 %v264_v12  ;;  %v528_v23 = vrot.slane %v526_v10, 5  ;;  %v649_v7 = vunpack.c.l.b16 %v466_v5 }
  0x3a   : > { %v532_v25 = vrot.slane %v530_v17, 4  ;;  %v536_v26 = vshll.u32 %v234_v6, 16  ;;  %v1195_v27 = vrot.slane %v1529_v47, 9  ;;  %v523_v29 = vor.u32 %v522_v22, %v519_v8 }
  0x3b   : > { %636 = vrot.lane.b32.xlu1 %v1543_v2, %s1335_s22  ;;  %v624_v16 = vpack.c.b16 %v609_v20, %v608_v18  ;;  %v545_v30 = vrot.slane %v233_v51, 5  ;;  %v548_v31 = vrot.slane %v234_v6, 5  ;;  %v266_v38 = vshrl.u32 %v1559_v24, 16  ;;  %v218_v20 = vld [vmem:[%s1386_s19 + $0x28] sm:$0xf] }
  0x3c   : > { %v533_v33 = vor.u32 %v532_v25, %v528_v23  ;;  %v538_v34 = vrot.slane %v536_v26, 5  ;;  %v269_v39 = vshll.u32 %v1559_v24, 16  ;;  %v524_v40 = vrot.slane %v523_v29, 4  ;;  %v217_v26 = vld [vmem:[%s1386_s19 + $0x24] sm:$0xf] }
  0x3d   : > { %760 = vrot.lane.b32.xlu2 %v1556_v21, %s1337_s24  ;;  %v547_v42 = vrot.slane %v545_v30, 4  ;;  %v275_v43 = vshll.u32 %v1563_v28, 16  ;;  %v664_v44 = vpack.c.b16 %v649_v7, %v648_v13  ;;  %v268_v49 = vrot.slane %v266_v38, 4 }
  0x3e   : > { %v534_v47 = vrot.slane %v533_v33, 4  ;;  %v271_v50 = vrot.slane %v269_v39, 5  ;;  %v529_v52 = vsel %vm1409_vm5, %v524_v40, %v528_v23  ;;  %v546_v53 = vsel %vm1388_vm2, %v1195_v27, %v545_v30 }
  0x3f   : > { %632 = vrot.lane.b32.xlu0 %v624_v16, %s1335_s22  ;;  %v277_v54 = vrot.slane %v275_v43, 5  ;;  %v279_v55 = vshrl.u32 %v1563_v28, 16  ;;  %v707_v56 = vunpack.c.l.b16 %v529_v52  ;;  %v549_v60 = vsel %vm1388_vm2, %v547_v42, %v548_v31  ;;  %v219_v16 = vld [vmem:[%s1386_s19 + $0x2c] sm:$0x1] }
  0x40   : > { %v539_v51 = vsel %vm1409_vm5, %v534_v47, %v538_v34  ;;  %v272_v63 = vor.u32 %v271_v50, %v268_v49  ;;  %v285_v4 = vshll.u32 %v1573_v45, 16  ;;  %v1189_v5 = vrot.slane %v1474_v35, 9 }
  0x41   : > { %v708_v1 = vunpack.c.l.b16 %v539_v51  ;;  %v281_v3 = vrot.slane %v279_v55, 4  ;;  %v726_v6 = vunpack.c.l.b16 %v546_v53  ;;  %v476_v8 = vrot.slane %v1479_v41, 5 }
  0x42   : > { %v479_v9 = vrot.slane %v1497_v59, 5  ;;  %v727_v11 = vunpack.c.l.b16 %v549_v60  ;;  %v273_v12 = vrot.slane %v272_v63, 4  ;;  %v287_v17 = vrot.slane %v285_v4, 5 }
  0x43   : > { %672 = vrot.lane.b32.xlu1 %v664_v44, %s1334_s21  ;;  %v1590_v10 = vpack.c.b16 %v708_v1, %v707_v56  ;;  %v282_v13 = vor.u32 %v281_v3, %v277_v54  ;;  %v477_v18 = vsel %vm1388_vm2, %v1189_v5, %v476_v8  ;;  %v478_v35 = vrot.slane %v476_v8, 4 }
  0x44   : > { %v652_v59 = vunpack.c.l.b16 %v477_v18  ;;  %v1601_v23 = vpack.c.b16 %v727_v11, %v726_v6  ;;  %v278_v7 = vsel %vm1409_vm5, %v273_v12, %v277_v54  ;;  %v483_v29 = vrot.slane %v218_v20, 5  ;;  %v1627_v6 = vld [vmem:[%s1386_s19 + $0xc] sm:$0xff]  ;;  %v1634_v11 = vld [vmem:[%s1386_s19 + $0x24] sm:$0xff] }
  0x45   : > { %775 = vrot.lane.b32.xlu2 %v1476_v36, %s1339_s26  ;;  %v283_v41 = vrot.slane %v282_v13, 4  ;;  %v480_v22 = vsel %vm1388_vm2, %v478_v35, %v479_v9  ;;  %v314_v30 = vshrl.u32 %v217_v26, 16  ;;  %v610_v33 = vunpack.c.l.b16 %v278_v7 }
  0x46   : > { %v653_v25 = vunpack.c.l.b16 %v480_v22  ;;  %v1190_v34 = vrot.slane %v217_v26, 9  ;;  %v317_v39 = vshll.u32 %v217_v26, 16  ;;  %v486_v42 = vrot.slane %v219_v16, 5  ;;  %v1664_v26 = vld [vmem:[%s1386_s19 + $0x30] sm:$0xff] }
  0x47   : > { %779 = vrot.lane.b32.xlu0 %v1590_v10, %s1339_s26  ;;  %v288_v27 = vsel %vm1409_vm5, %v283_v41, %v287_v17  ;;  %v316_v38 = vrot.slane %v314_v30, 4  ;;  %v323_v43 = vshll.u32 %v218_v20, 16  ;;  %v327_v44 = vshrl.u32 %v218_v20, 16 }
  0x48   : > { %v1609_v31 = vpack.c.b16 %v653_v25, %v652_v59  ;;  %v611_v40 = vunpack.c.l.b16 %v288_v27  ;;  %v485_v47 = vrot.slane %v483_v29, 4  ;;  %v469_v49 = vrot.slane %v1563_v28, 5  ;;  %v1659_v25 = vld [vmem:[%s1386_s19 + $0x18] sm:$0xff] }
  0x49   : > { %v319_v50 = vrot.slane %v317_v39, 5  ;;  %v333_v52 = vshll.u32 %v219_v16, 16  ;;  %v325_v53 = vrot.slane %v323_v43, 5  ;;  %v329_v54 = vrot.slane %v327_v44, 4  ;;  %v235_v16 = vld [vmem:[%s1386_s19 + $0x6c] sm:$0xf] }
  0x4a   : > { %v484_v55 = vsel %vm1388_vm2, %v1190_v34, %v483_v29  ;;  %v1620_v56 = vpack.c.b16 %v611_v40, %v610_v33  ;;  %v1188_v28 = vrot.slane %v1559_v24, 9  ;;  %v487_v1 = vsel %vm1388_vm2, %v485_v47, %v486_v42  ;;  %v236_v29 = vld [vmem:[%s1386_s19 + $0x70] sm:$0xf]  ;;  %v237_v47 = vld [vmem:[%s1386_s19 + $0x74] sm:$0x1] }
  0x4b   : > { %798 = vrot.lane.b32.xlu1 %v1601_v23, %s1340_s27  ;;  %v320_v51 = vor.u32 %v319_v50, %v316_v38  ;;  %v330_v60 = vor.u32 %v329_v54, %v325_v53  ;;  %v335_v63 = vrot.slane %v333_v52, 5  ;;  %v471_v3 = vrot.slane %v469_v49, 4  ;;  %v1265_v44 = vld [vmem:[%s1386_s19 + $0x6c] sm:$0xff] }
  0x4c   : > { %v472_v4 = vrot.slane %v1573_v45, 5  ;;  %v654_v24 = vunpack.c.l.b16 %v484_v55  ;;  %v655_v12 = vunpack.c.l.b16 %v487_v1  ;;  %v470_v45 = vsel %vm1388_vm2, %v1188_v28, %v469_v49 }
  0x4d   : > { %676 = vrot.lane.b32.xlu2 %v1609_v31, %s1334_s21  ;;  %v321_v5 = vrot.slane %v320_v51, 4  ;;  %v331_v8 = vrot.slane %v330_v60, 4  ;;  %v650_v59 = vunpack.c.l.b16 %v470_v45  ;;  %v551_v30 = vshrl.u32 %v235_v16, 16  ;;  %v1267_v60 = vld [vmem:[%s1922_s1 + $0x8] sm:$0x30] }
  0x4e   : > { %v473_v17 = vsel %vm1388_vm2, %v471_v3, %v472_v4  ;;  %v1646_v41 = vpack.c.b16 %v655_v12, %v654_v24  ;;  %v554_v33 = vshll.u32 %v235_v16, 16  ;;  %v560_v34 = vshll.u32 %v236_v29, 16 }
  0x4f   : > { %794 = vrot.lane.b32.xlu0 %v1437_v57, %s1340_s27  ;;  %v326_v9 = vsel %vm1409_vm5, %v321_v5, %v325_v53  ;;  %v336_v13 = vsel %vm1409_vm5, %v331_v8, %v335_v63  ;;  %v651_v20 = vunpack.c.l.b16 %v473_v17  ;;  %v564_v38 = vshrl.u32 %v236_v29, 16 }
  0x50   : > { %v614_v18 = vunpack.c.l.b16 %v326_v9  ;;  %v615_v35 = vunpack.c.l.b16 %v336_v13  ;;  %v553_v39 = vrot.slane %v551_v30, 4  ;;  %v556_v40 = vrot.slane %v554_v33, 5 }
  0x51   : > { %v1652_v7 = vpack.c.b16 %v651_v20, %v650_v59  ;;  %v562_v42 = vrot.slane %v560_v34, 5  ;;  %v566_v43 = vrot.slane %v564_v38, 4  ;;  %v570_v52 = vshll.u32 %v237_v47, 16 }
  0x52   : > { %v1648_v22 = vpack.c.b16 %v615_v35, %v614_v18  ;;  %v557_v49 = vor.u32 %v556_v40, %v553_v39  ;;  %v579_v1 = vrot.slane %v236_v29, 5  ;;  %v1341_v4 = vmov 65535  }
  0x53   : > { %710 = vrot.lane.b32.xlu1 %v1620_v56, %s1336_s23  ;;  %v567_v50 = vor.u32 %v566_v43, %v562_v42  ;;  %v572_v54 = vrot.slane %v570_v52, 5  ;;  %v984_v5 = vsel %vm982_vm6, 4294967295, %v1341_v4  ;;  %v1196_v12 = vrot.slane %v235_v16, 9 }
  0x54   : > { %v985_v8 = vsel %vm983_vm7, %v984_v5, 0  ;;  %v581_v13 = vrot.slane %v579_v1, 4  ;;  %v582_v45 = vrot.slane %v237_v47, 5 }
  0x55   : > { %691 = vrot.lane.b32.xlu2 %v1627_v6, %s1333_s20  ;;  %v568_v53 = vrot.slane %v567_v50, 4  ;;  %v580_v35 = vsel %vm1388_vm2, %v1196_v12, %v579_v1 }
  0x56   : > { %v583_v59 = vsel %vm1388_vm2, %v581_v13, %v582_v45  ;;  %v783_v29 = vunpack.c.l.b16 %v580_v35 }
  0x57   : > { %695 = vrot.lane.b32.xlu0 %v1634_v11, %s1333_s20  ;;  %v573_v28 = vsel %vm1409_vm5, %v568_v53, %v572_v54  ;;  %v784_v30 = vunpack.c.l.b16 %v583_v59 }
  0x59   : > { %v785_v34 = vpack.c.b16 %v784_v30, %v783_v29 }
  0x5b   : > { %733 = vrot.lane.b32.xlu1 %v1646_v41, %s1338_s25 }
  0x5d   : > { %714 = vrot.lane.b32.xlu2 %v1648_v22, %s1336_s23 }
  0x5f   : > { %729 = vrot.lane.b32.xlu0 %v1652_v7, %s1338_s25 }
  0x63   : > { %767 = vrot.lane.b32.xlu1 %v1543_v2, %s1339_s26 }
  0x65   : > { %748 = vrot.lane.b32.xlu2 %v1659_v25, %s1337_s24 }
  0x67   : > { %752 = vrot.lane.b32.xlu0 %v1664_v26, %s1337_s24 }
  0x6b   : > { %790 = vrot.lane.b32.xlu1 %v1415_v37, %s1340_s27 }
  0x6d   : > { %771 = vrot.lane.b32.xlu2 %v1444_v62, %s1339_s26 }
  0x6e   : > { %v1684_v27 = vpop.permute.xlu2 %699 }
  0x6f   : > { %786 = vrot.lane.b32.xlu0 %v1609_v31, %s1340_s27 }
  0x73   : > { %682 = vrot.lane.b32.xlu1 %v1535_v48, %s1334_s21 }
  0x75   : > { %642 = vrot.lane.b32.xlu2 %v1510_v14, %s1335_s22 }
  0x77   : > { %646 = vrot.lane.b32.xlu0 %v1492_v58, %s1335_s22 }
  0x7b   : > { %705 = vrot.lane.b32.xlu1 %v1556_v21, %s1333_s20  ;;  %v1696_v21 = vpop.permute.xlu2 %703 }
  0x7d   : > { %686 = vrot.lane.b32.xlu2 %v1512_v15, %s1334_s21 }
  0x7f   : > { %701 = vrot.lane.b32.xlu0 %v1521_v61, %s1333_s20 }
  0x83   : > { %739 = vrot.lane.b32.xlu1 %v1437_v57, %s1338_s25 }
  0x85   : > { %720 = vrot.lane.b32.xlu2 %v1476_v36, %s1336_s23  ;;  %v558_v36 = vrot.slane %v557_v49, 4 }
  0x87   : > { %724 = vrot.lane.b32.xlu0 %v1590_v10, %s1336_s23  ;;  %v563_v51 = vsel %vm1409_vm5, %v558_v36, %v562_v42 }
  0x88   : > { %v764_v32 = vunpack.c.l.b16 %v563_v51 }
  0x8b   : > { %762 = vrot.lane.b32.xlu1 %v1265_v44, %s1337_s24 }
  0x8c   : > { %v1703_v57 = vpop.permute.xlu1 %680 }
  0x8d   : > { %743 = vrot.lane.b32.xlu2 %v1601_v23, %s1338_s25  ;;  %v1243_v23 = vld [vmem:[%s1922_s1 + $0x8] sm:$0xf] }
  0x8e   : > { %v1244_v3 = vor.u32 %v1267_v60, %v1243_v23 }
  0x8f   : > { %758 = vrot.lane.b32.xlu0 %v1423_v46, %s1337_s24  ;;  %v1709_v55 = vpop.permute.xlu2 %737 }
  0x90   : > { %v987_v9 = vand.u32 %v1244_v3, %v985_v8  ;;  %v1256_v3 = vld [vmem:[%s1386_s19] sm:$0xff] }
  0x91   : > { %v641_v10 = vpop.permute.xlu0 %640 }
  0x92   : > { %1270 = vmatpush.bf16.msra.mxu3 %v987_v9  ;;  %1269 = vmatpush.bf16.msra.mxu2 %v987_v9  ;;  %v817_v44 = vsel %vm802_vm8, %v1664_v26, %v641_v10 }
  0x93   : > { %777 = vrot.lane.b32.xlu1 %v1492_v58, %s1339_s26  ;;  %v765_v58 = vunpack.c.l.b16 %v573_v28  ;;  %1268 = vmatpush.bf16.msra.mxu1 %v987_v9 }
  0x94   : > { %v685_v63 = vpop.permute.xlu1 %684  ;;  %995 = vmatpush.bf16.msra.mxu0 %v987_v9 }
  0x95   : > { %634 = vrot.lane.b32.xlu2 %v1620_v56, %s1335_s22  ;;  %v766_v18 = vpack.c.b16 %v765_v58, %v764_v32  ;;  %v1266_v56 = vld [vmem:[%s1922_s1] sm:$0xff] }
  0x96   : > { %1273 = vmatpush.bf16.msra.mxu3 %v1266_v56  ;;  %1272 = vmatpush.bf16.msra.mxu2 %v1266_v56 }
  0x97   : > { %638 = vrot.lane.b32.xlu0 %v1648_v22, %s1335_s22  ;;  %v1727_v24 = vpop.permute.xlu2 %760  ;;  %1271 = vmatpush.bf16.msra.mxu1 %v1266_v56 }
  0x98   : > { %996 = vmatpush.bf16.msra.mxu0 %v1266_v56 }
  0x99   : > { %v645_v17 = vpop.permute.xlu0 %644 }
  0x9a   : > { %v823_v40 = vsel %vm802_vm8, %v1521_v61, %v645_v17 }
  0x9b   : > { %678 = vrot.lane.b32.xlu1 %v1646_v41, %s1334_s21  ;;  %v841_v43 = vsel %vm827_vm9, %v823_v40, %v685_v63 }
  0x9d   : > { %v723_v20 = vpop.permute.xlu1 %722  ;;  %781 = vrot.lane.b32.xlu2 %v766_v18, %s1339_s26 }
  0x9f   : > { %674 = vrot.lane.b32.xlu0 %v1652_v7, %s1334_s21  ;;  %v776_v16 = vpop.permute.xlu2 %775 }
  0xa1   : > { %v719_v33 = vpop.permute.xlu0 %718 }
  0xa3   : > { %693 = vrot.lane.b32.xlu1 %v1659_v25, %s1333_s20 }
  0xa5   : > { %v757_v0 = vpop.permute.xlu1 %756  ;;  %796 = vrot.lane.b32.xlu2 %v1512_v15, %s1340_s27 }
  0xa7   : > { %800 = vrot.lane.b32.xlu0 %v785_v34, %s1340_s27  ;;  %v677_v38 = vpop.permute.xlu2 %676 }
  0xa9   : > { %v742_v39 = vpop.permute.xlu0 %741 }
  0xab   : > { %716 = vrot.lane.b32.xlu1 %v1444_v62, %s1336_s23  ;;  %v858_v62 = vsel %vm844_vm10, %v841_v43, %v1696_v21 }
  0xad   : > { %v637_v7 = vpop.permute.xlu1 %636  ;;  %697 = vrot.lane.b32.xlu2 %v1664_v26, %s1333_s20  ;;  %v875_v26 = vsel %vm861_vm11, %v858_v62, %v723_v20 }
  0xae   : > { %v892_v50 = vsel %vm878_vm12, %v875_v26, %v742_v39  ;;  %v811_v63 = vsel %vm802_vm8, %v1659_v25, %v637_v7 }
  0xaf   : > { %712 = vrot.lane.b32.xlu0 %v1543_v2, %s1336_s23  ;;  %v692_v42 = vpop.permute.xlu2 %691  ;;  %v837_v2 = vsel %vm827_vm9, %v817_v44, %v1703_v57  ;;  %v833_v4 = vsel %vm827_vm9, %v811_v63, %v677_v38 }
  0xb0   : > { %v854_v49 = vsel %vm844_vm10, %v837_v2, %v1684_v27 }
  0xb1   : > { %v633_v15 = vpop.permute.xlu0 %632  ;;  %v871_v52 = vsel %vm861_vm11, %v854_v49, %v719_v33 }
  0xb2   : > { %v805_v58 = vsel %vm802_vm8, %v1256_v3, %v633_v15 }
  0xb3   : > { %750 = vrot.lane.b32.xlu1 %v1634_v11, %s1337_s24 }
  0xb5   : > { %v673_v61 = vpop.permute.xlu1 %672  ;;  %731 = vrot.lane.b32.xlu2 %v1609_v31, %s1338_s25  ;;  %v888_v31 = vsel %vm878_vm12, %v871_v52, %v1709_v55 }
  0xb6   : > { %v905_v36 = vsel %vm895_vm13, %v888_v31, %v757_v0  ;;  %v829_v8 = vsel %vm827_vm9, %v805_v58, %v673_v61 }
  0xb7   : > { %735 = vrot.lane.b32.xlu0 %v1415_v37, %s1338_s25  ;;  %v715_v47 = vpop.permute.xlu2 %714  ;;  %v909_v37 = vsel %vm895_vm13, %v892_v50, %v1727_v24  ;;  %v922_v54 = vsel %vm912_vm15, %v905_v36, %v776_v16  ;;  %v846_v25 = vsel %vm844_vm10, %v829_v8, %v692_v42 }
  0xb9   : > { %v780_v21 = vpop.permute.xlu0 %779 }
  0xba   : > { %v926_v27 = vsel %vm912_vm15, %v909_v37, %v780_v21 }
  0xbb   : > { %773 = vrot.lane.b32.xlu1 %v1510_v14, %s1339_s26 }
  0xbd   : > { %v799_v57 = vpop.permute.xlu1 %798  ;;  %754 = vrot.lane.b32.xlu2 %v1401_v19, %s1337_s24 }
  0xbe   : > { %v943_v53 = vsel %vm929_vm14, %v926_v27, %v799_v57 }
  0xbf   : > { %769 = vrot.lane.b32.xlu0 %v1648_v22, %s1339_s26  ;;  %1251 = vmatmul.msk.bf16.vlgmr.msra.gmra.mxu3 %vm965_vm0, %v943_v53  ;;  %v749_v14 = vpop.permute.xlu2 %748 }
  0xc1   : > { %v795_v55 = vpop.permute.xlu0 %794 }
  0xc2   : > { %v939_v10 = vsel %vm929_vm14, %v922_v54, %v795_v55 }
  0xc3   : > { %1249 = vmatmul.msk.bf16.vlgmr.msra.gmra.mxu2 %vm965_vm0, %v939_v10 }
  0xc5   : > { %v711_v51 = vpop.permute.xlu1 %710  ;;  %788 = vrot.lane.b32.xlu2 %v1646_v41, %s1340_s27 }
  0xc6   : > { %v863_v13 = vsel %vm861_vm11, %v846_v25, %v711_v51 }
  0xc7   : > { %792 = vrot.lane.b32.xlu0 %v1535_v48, %s1340_s27  ;;  %v772_v28 = vpop.permute.xlu2 %771 }
  0xc9   : > { %v696_v22 = vpop.permute.xlu0 %695 }
  0xca   : > { %v850_v5 = vsel %vm844_vm10, %v833_v4, %v696_v22 }
  0xcb   : > { %v867_v48 = vsel %vm861_vm11, %v850_v5, %v715_v47 }
  0xcd   : > { %v734_v23 = vpop.permute.xlu1 %733 }
  0xce   : > { %v884_v9 = vsel %vm878_vm12, %v867_v48, %v734_v23 }
  0xcf   : > { %v643_v60 = vpop.permute.xlu2 %642 }
  0xd0   : > { %v820_v15 = vsel %vm802_vm8, %v1401_v19, %v643_v60 }
  0xd1   : > { %v730_v1 = vpop.permute.xlu0 %729 }
  0xd2   : > { %v880_v45 = vsel %vm878_vm12, %v863_v13, %v730_v1 }
  0xd3   : > { %v897_v59 = vsel %vm895_vm13, %v880_v45, %v749_v14 }
  0xd5   : > { %v768_v32 = vpop.permute.xlu1 %767 }
  0xd6   : > { %v914_v20 = vsel %vm912_vm15, %v897_v59, %v768_v32 }
  0xd7   : > { %v687_v41 = vpop.permute.xlu2 %686 }
  0xd9   : > { %v753_v24 = vpop.permute.xlu0 %752 }
  0xda   : > { %v901_v12 = vsel %vm895_vm13, %v884_v9, %v753_v24 }
  0xdb   : > { %v918_v18 = vsel %vm912_vm15, %v901_v12, %v772_v28 }
  0xdd   : > { %v791_v17 = vpop.permute.xlu1 %790 }
  0xde   : > { %v935_v56 = vsel %vm929_vm14, %v918_v18, %v791_v17 }
  0xdf   : > { %1247 = vmatmul.msk.bf16.vlgmr.msra.gmra.mxu1 %vm965_vm0, %v935_v56  ;;  %v721_v35 = vpop.permute.xlu2 %720 }
  0xe1   : > { %v787_v16 = vpop.permute.xlu0 %786 }
  0xe2   : > { %v931_v29 = vsel %vm929_vm14, %v914_v20, %v787_v16  ;;  %v1856_v20 = vld [vmem:[%s1923_s2] ss:$0 sm:$0xff] }
  0xe3   : > { %1245 = vmatmul.msk.bf16.vlgmr.msra.gmra.mxu0 %vm965_vm0, %v931_v29 }
  0xe5   : > { %v683_v30 = vpop.permute.xlu1 %682 }
  0xe6   : > { %v839_v44 = vsel %vm827_vm9, %v820_v15, %v683_v30 }
  0xe7   : > { %v744_v33 = vpop.permute.xlu2 %743 }
  0xe9   : > { %v647_v34 = vpop.permute.xlu0 %646 }
  0xea   : > { %v826_v37 = vsel %vm802_vm8, %v1423_v46, %v647_v34 }
  0xeb   : > { %v843_v27 = vsel %vm827_vm9, %v826_v37, %v687_v41 }
  0xed   : > { %v706_v0 = vpop.permute.xlu1 %705 }
  0xee   : > { %v860_v57 = vsel %vm844_vm10, %v843_v27, %v706_v0 }
  0xef   : > { %v635_v38 = vpop.permute.xlu2 %634 }
  0xf0   : > { %v808_v3 = vsel %vm802_vm8, %v1627_v6, %v635_v38 }
  0xf1   : > { %v702_v39 = vpop.permute.xlu0 %701 }
  0xf2   : > { %v856_v62 = vsel %vm844_vm10, %v839_v44, %v702_v39 }
  0xf3   : > { %v873_v2 = vsel %vm861_vm11, %v856_v62, %v721_v35 }
  0xf5   : > { %v740_v7 = vpop.permute.xlu1 %739 }
  0xf6   : > { %v890_v47 = vsel %vm878_vm12, %v873_v2, %v740_v7 }
  0xf7   : > { %v782_v42 = vpop.permute.xlu2 %781 }
  0xf9   : > { %v725_v40 = vpop.permute.xlu0 %724 }
  0xfa   : > { %v877_v53 = vsel %vm861_vm11, %v860_v57, %v725_v40 }
  0xfb   : > { %v894_v54 = vsel %vm878_vm12, %v877_v53, %v744_v33 }
  0xfd   : > { %v763_v43 = vpop.permute.xlu1 %762 }
  0xfe   : > { %v911_v55 = vsel %vm895_vm13, %v894_v54, %v763_v43 }
  0xff   : > { %v797_v26 = vpop.permute.xlu2 %796  ;;  %v928_v51 = vsel %vm912_vm15, %v911_v55, %v782_v42 }
 0x101   : > { %v759_v61 = vpop.permute.xlu0 %758 }
 0x102   : > { %v907_v49 = vsel %vm895_vm13, %v890_v47, %v759_v61 }
 0x105   : > { %v778_v50 = vpop.permute.xlu1 %777 }
 0x106   : > { %v924_v21 = vsel %vm912_vm15, %v907_v49, %v778_v50 }
 0x107   : > { %v941_v52 = vsel %vm929_vm14, %v924_v21, %v797_v26  ;;  %v698_v14 = vpop.permute.xlu2 %697 }
 0x108   : > { %1250 = vmatmul.msk.bf16.gmra.mxu2 %vm965_vm0, %v941_v52 }
 0x109   : > { %v639_v19 = vpop.permute.xlu0 %638 }
 0x10a   : > { %v814_v41 = vsel %vm802_vm8, %v1634_v11, %v639_v19 }
 0x10d   : > { %v679_v31 = vpop.permute.xlu1 %678 }
 0x10e   : > { %v835_v8 = vsel %vm827_vm9, %v814_v41, %v679_v31 }
 0x10f   : > { %v732_v46 = vpop.permute.xlu2 %731  ;;  %v852_v25 = vsel %vm844_vm10, %v835_v8, %v698_v14 }
 0x111   : > { %v675_v36 = vpop.permute.xlu0 %674 }
 0x112   : > { %v831_v4 = vsel %vm827_vm9, %v808_v3, %v675_v36 }
 0x115   : > { %v694_v10 = vpop.permute.xlu1 %693 }
 0x116   : > { %v848_v5 = vsel %vm844_vm10, %v831_v4, %v694_v10 }
 0x117   : > { %v755_v63 = vpop.permute.xlu2 %754 }
 0x119   : > { %v801_v28 = vpop.permute.xlu0 %800 }
 0x11a   : > { %v945_v22 = vsel %vm929_vm14, %v928_v51, %v801_v28 }
 0x11b   : > { %1252 = vmatmul.msk.bf16.gmra.mxu3 %vm965_vm0, %v945_v22 }
 0x11d   : > { %v717_v60 = vpop.permute.xlu1 %716 }
 0x11e   : > { %v869_v45 = vsel %vm861_vm11, %v852_v25, %v717_v60 }
 0x11f   : > { %v789_v9 = vpop.permute.xlu2 %788 }
 0x121   : > { %v713_v23 = vpop.permute.xlu0 %712 }
 0x122   : > { %v865_v58 = vsel %vm861_vm11, %v848_v5, %v713_v23 }
 0x123   : > { %v882_v48 = vsel %vm878_vm12, %v865_v58, %v732_v46 }
 0x125   : > { %v751_v32 = vpop.permute.xlu1 %750 }
 0x126   : > { %v899_v24 = vsel %vm895_vm13, %v882_v48, %v751_v32 }
 0x129   : > { %v736_v1 = vpop.permute.xlu0 %735 }
 0x12a   : > { %v886_v11 = vsel %vm878_vm12, %v869_v45, %v736_v1 }
 0x12b   : > { %v903_v18 = vsel %vm895_vm13, %v886_v11, %v755_v63 }
 0x12d   : > { %v774_v17 = vpop.permute.xlu1 %773 }
 0x12e   : > { %v920_v56 = vsel %vm912_vm15, %v903_v18, %v774_v17 }
 0x131   : > { %v770_v12 = vpop.permute.xlu0 %769 }
 0x132   : > { %v916_v6 = vsel %vm912_vm15, %v899_v24, %v770_v12 }
 0x133   : > { %v933_v13 = vsel %vm929_vm14, %v916_v6, %v789_v9 }
 0x134   : > { %1246 = vmatmul.msk.bf16.gmra.mxu0 %vm965_vm0, %v933_v13 }
 0x139   : > { %v793_v35 = vpop.permute.xlu0 %792 }
 0x13a   : > { %v937_v59 = vsel %vm929_vm14, %v920_v56, %v793_v35 }
 0x13b   : > { %1248 = vmatmul.msk.bf16.gmra.mxu1 %vm965_vm0, %v937_v59 }
 0x142   : > { %v1028_v16 = vpop.f32.mrf.mxu3 }
 0x143   : > { %v1029_v29 = vadd.f32 %v1856_v20, %v1028_v16 }
 0x145   : > { %v1050_v30 = vmax.f32 %v1029_v29, 0.0 }
 0x146   : > { %v1018_v33 = vpop.f32.mrf.mxu2 }
 0x147   : > { %v1066_v34 = vpack.c.bf16 %v1050_v30, %v1050_v30  ;;  %v1019_v0 = vadd.f32 %v1856_v20, %v1018_v33 }
 0x149   : > { %1083 = vst.msk [vmem:[%s1863_s16 + $0x30] sm:$0xf] %vm1070_vm1, %v1066_v34  ;;  %v1046_v38 = vmax.f32 %v1019_v0, 0.0 }
 0x14a   : > { %v1030_v39 = vpop.f32.mrf.mxu3 }
 0x14b   : > { %v1062_v7 = vpack.c.bf16 %v1046_v38, %v1046_v38  ;;  %v1031_v40 = vadd.f32 %v1856_v20, %v1030_v39 }
 0x14d   : > { %1079 = vst.msk [vmem:[%s1863_s16 + $0x20] sm:$0xf] %vm1070_vm1, %v1062_v7  ;;  %v1051_v42 = vmax.f32 %v1031_v40, 0.0 }
 0x14e   : > { %v1020_v15 = vpop.f32.mrf.mxu2 }
 0x14f   : > { %v1067_v43 = vpack.c.bf16 %v1051_v42, %v1051_v42  ;;  %v1021_v44 = vadd.f32 %v1856_v20, %v1020_v15 }
 0x151   : > { %1084 = vst.msk [vmem:[%s1863_s16 + $0x34] sm:$0xf] %vm1070_vm1, %v1067_v43  ;;  %v1047_v62 = vmax.f32 %v1021_v44, 0.0 }
 0x153   : > { %v1063_v61 = vpack.c.bf16 %v1047_v62, %v1047_v62 }
 0x155   : > { %1080 = vst.msk [vmem:[%s1863_s16 + $0x24] sm:$0xf] %vm1070_vm1, %v1063_v61 }
 0x15c   : > { %v1008_v2 = vpop.f32.mrf.mxu1 }
 0x15d   : > { %v1009_v47 = vadd.f32 %v1856_v20, %v1008_v2 }
 0x15f   : > { %v1042_v26 = vmax.f32 %v1009_v47, 0.0 }
 0x160   : > { %v998_v49 = vpop.f32.mrf.mxu0 }
 0x161   : > { %v1058_v50 = vpack.c.bf16 %v1042_v26, %v1042_v26  ;;  %v999_v21 = vadd.f32 %v1856_v20, %v998_v49 }
 0x163   : > { %1075 = vst.msk [vmem:[%s1863_s16 + $0x10] sm:$0xf] %vm1070_vm1, %v1058_v50  ;;  %v1038_v52 = vmax.f32 %v999_v21, 0.0 }
 0x164   : > { %v1010_v19 = vpop.f32.mrf.mxu1 }
 0x165   : > { %v1054_v37 = vpack.c.bf16 %v1038_v52, %v1038_v52  ;;  %v1011_v31 = vadd.f32 %v1856_v20, %v1010_v19 }
 0x167   : > { %1071 = vst.msk [vmem:[%s1863_s16] sm:$0xf] %vm1070_vm1, %v1054_v37  ;;  %v1043_v27 = vmax.f32 %v1011_v31, 0.0 }
 0x168   : > { %v1000_v57 = vpop.f32.mrf.mxu0 }
 0x169   : > { %v1059_v36 = vpack.c.bf16 %v1043_v27, %v1043_v27  ;;  %v1001_v53 = vadd.f32 %v1856_v20, %v1000_v57 }
 0x16b   : > { %1076 = vst.msk [vmem:[%s1863_s16 + $0x14] sm:$0xf] %vm1070_vm1, %v1059_v36  ;;  %v1039_v14 = vmax.f32 %v1001_v53, 0.0 }
 0x16d   : > { %v1055_v54 = vpack.c.bf16 %v1039_v14, %v1039_v14 }
 0x16f   : > { %1072 = vst.msk [vmem:[%s1863_s16 + $0x4] sm:$0xf] %vm1070_vm1, %v1055_v54 }
 0x18b   : > { %v1023_v55 = vpop.f32.mrf.mxu2 }
 0x18c   : > { %v1024_v10 = vadd.f32 %v1856_v20, %v1023_v55 }
 0x18e   : > { %v1048_v51 = vmax.f32 %v1024_v10, 0.0 }
 0x190   : > { %v1064_v28 = vpack.c.bf16 %v1048_v51, %v1048_v51 }
 0x192   : > { %1081 = vst.msk [vmem:[%s1863_s16 + $0x28] sm:$0xf] %vm1070_vm1, %v1064_v28 }
 0x193   : > { %v1025_v22 = vpop.f32.mrf.mxu2 }
 0x194   : > { %v1026_v46 = vadd.f32 %v1856_v20, %v1025_v22 }
 0x196   : > { %v1049_v23 = vmax.f32 %v1026_v46, 0.0 }
 0x198   : > { %v1065_v60 = vpack.c.bf16 %v1049_v23, %v1049_v23 }
 0x19a   : > { %1082 = vst.msk [vmem:[%s1863_s16 + $0x2c] sm:$0xf] %vm1070_vm1, %v1065_v60 }
 0x19e   : > { %v1033_v63 = vpop.f32.mrf.mxu3 }
 0x19f   : > { %v1034_v1 = vadd.f32 %v1856_v20, %v1033_v63 }
 0x1a1   : > { %v1052_v3 = vmax.f32 %v1034_v1, 0.0 }
 0x1a3   : > { %v1068_v4 = vpack.c.bf16 %v1052_v3, %v1052_v3 }
 0x1a5   : > { %1085 = vst.msk [vmem:[%s1863_s16 + $0x38] sm:$0xf] %vm1070_vm1, %v1068_v4 }
 0x1a6   : > { %v1035_v5 = vpop.f32.mrf.mxu3 }
 0x1a7   : > { %v1036_v32 = vadd.f32 %v1856_v20, %v1035_v5 }
 0x1a9   : > { %v1053_v58 = vmax.f32 %v1036_v32, 0.0 }
 0x1ab   : > { %v1069_v41 = vpack.c.bf16 %v1053_v58, %v1053_v58 }
 0x1ad   : > { %1086 = vst.msk [vmem:[%s1863_s16 + $0x3c] sm:$0xf] %vm1070_vm1, %v1069_v41 }
 0x1b1   : > { %v1003_v8 = vpop.f32.mrf.mxu0 }
 0x1b2   : > { %v1004_v48 = vadd.f32 %v1856_v20, %v1003_v8 }
 0x1b4   : > { %v1040_v9 = vmax.f32 %v1004_v48, 0.0 }
 0x1b6   : > { %v1056_v24 = vpack.c.bf16 %v1040_v9, %v1040_v9 }
 0x1b8   : > { %1073 = vst.msk [vmem:[%s1863_s16 + $0x8] sm:$0xf] %vm1070_vm1, %v1056_v24  ;;  %v1013_v12 = vpop.f32.mrf.mxu1 }
 0x1b9   : > { %v1014_v6 = vadd.f32 %v1856_v20, %v1013_v12  ;;  %v1005_v25 = vpop.f32.mrf.mxu0 }
 0x1ba   : > { %v1006_v13 = vadd.f32 %v1856_v20, %v1005_v25 }
 0x1bb   : > { %v1044_v45 = vmax.f32 %v1014_v6, 0.0 }
 0x1bc   : > { %v1041_v11 = vmax.f32 %v1006_v13, 0.0 }
 0x1bd   : > { %v1060_v17 = vpack.c.bf16 %v1044_v45, %v1044_v45 }
 0x1be   : > { %v1057_v18 = vpack.c.bf16 %v1041_v11, %v1041_v11 }
 0x1bf   : > { %1077 = vst.msk [vmem:[%s1863_s16 + $0x18] sm:$0xf] %vm1070_vm1, %v1060_v17 }
 0x1c0   : > { %1074 = vst.msk [vmem:[%s1863_s16 + $0xc] sm:$0xf] %vm1070_vm1, %v1057_v18  ;;  %v1015_v56 = vpop.f32.mrf.mxu1 }
 0x1c1   : > { %v1016_v35 = vadd.f32 %v1856_v20, %v1015_v56 }
 0x1c3   : > { %v1045_v59 = vmax.f32 %v1016_v35, 0.0 }
 0x1c5   : > { %v1061_v16 = vpack.c.bf16 %v1045_v59, %v1045_v59 }
 0x1c7   : > { %1078 = vst.msk [vmem:[%s1863_s16 + $0x1c] sm:$0xf] %vm1070_vm1, %v1061_v16 }
 0x1c8 PF: > { %s13_s14 = sadd.s32 1, %s1331_s14   ;;  %s1929_s12 = smov %s1327_s13 }
 0x1c9   : > { %p10_p5 = scmp.ge.s32.totalorder %s13_s14, 4   ;;  %s1930_s13 = smov %s1932_s15 }
 0x1cb   :  { %12 = sbr.rel (!%p10_p5) target bundleno = 2 (0x2), region = 62 }

</bundles_post_ra>
